<compile_context>
chip_gen: v5e
topology: v5e:2x2
jax: 0.10.0
libtpu: 0.0.40
codegen_flags: <defaults>
</compile_context>

<pallas_src>
import jax
import jax.numpy as jnp
from jax.experimental import pallas as pl
from jax.experimental.pallas import tpu as pltpu


def _conv1x1_kernel(w_ref, b_ref, x_ref, o_ref):
    # w_ref: (Cout, Cin)        weight, resident across the whole grid
    # b_ref: (Cout, 1)          bias, broadcast along batch and lane axes
    # x_ref: (NB, Cin, S_TILE)  a block of images' spatial tile (lane-dense)
    # o_ref: (NB, Cout, S_TILE) output tile, written directly in NCHW order
    acc = jnp.einsum(
        "oc,bcs->bos", w_ref[...], x_ref[...],
        preferred_element_type=jnp.float32,
    )
    bias = b_ref[...].astype(jnp.float32)[None, :, :]   # (1, Cout, 1)
    o_ref[...] = (acc + bias).astype(o_ref.dtype)


def _vmem_limits():
    """(vmem_limit_bytes, tile_budget_bytes) sized for the local TPU generation."""
    phys = None
    try:
        info = pltpu.get_tpu_info()
        phys = getattr(info, "vmem_capacity_bytes", None)
    except Exception:
        phys = None
    if phys is None:
        phys = 64 * 1024 * 1024  # conservative: v7x per-TensorCore VMEM
    if phys <= 64 * 1024 * 1024:           # v7x
        vmem_limit = 48 * 1024 * 1024
    else:                                   # v5e / v6e (128 MiB physical)
        vmem_limit = 96 * 1024 * 1024
    tile_budget = int(vmem_limit * 0.75)    # headroom for compiler internals
    return vmem_limit, tile_budget


def _largest_divisor_leq(n, cap):
    cap = max(1, min(cap, n))
    for d in range(cap, 0, -1):
        if n % d == 0:
            return d
    return 1


def _pick_spatial_tile(hw, s_max):
    """Largest multiple-of-128 tile <= s_max, preferring one that divides hw."""
    if hw <= s_max:
        return hw                           # full-dim block: always legal
    t = s_max
    floor = max(128, s_max // 2)
    while t >= floor:
        if hw % t == 0:
            return t                        # no ragged tail
        t -= 128
    return s_max                            # accept one masked tail tile


def conv1_forward(x_nchw, weight, bias):
    """x_nchw: (N, Cin, H, W); weight: (Cout, Cin, 1, 1); bias: (Cout,)."""
    n, cin, h, w = x_nchw.shape
    cout = weight.shape[0]
    hw = h * w

    # Free, contiguous reshapes (no transposes / no extra HBM passes).
    x_mat = x_nchw.reshape(n, cin, hw)          # (N, Cin, H*W)
    w_mat = weight.reshape(cout, cin)           # (Cout, Cin)
    b_mat = bias.reshape(cout, 1)               # (Cout, 1)

    out_dtype = x_nchw.dtype
    x_item = x_mat.dtype.itemsize
    w_item = w_mat.dtype.itemsize
    b_item = b_mat.dtype.itemsize
    out_item = jnp.dtype(out_dtype).itemsize

    vmem_limit, tile_budget = _vmem_limits()

    # VMEM accounting: resident weight/bias (count double-buffered to be safe)
    # plus double-buffered x and out tiles.
    resident = 2 * (cout * cin * w_item + cout * b_item)
    avail = max(tile_budget - resident, 128 * 1024)
    per_lane = 2 * (cin * x_item + cout * out_item)   # bytes/lane per image

    lane_target = 8192   # per-step output lanes to amortise ~0.35us step cost
    if hw >= 2048:
        # Large spatial: one image per step, biggest lane-dense tile that fits.
        nb = 1
        s_max = max(128, ((avail // per_lane) // 128) * 128)
        s_tile = _pick_spatial_tile(hw, s_max)
    else:
        # Small spatial: full H*W per step, fold several images per step.
        s_tile = hw
        nb_max = max(1, avail // max(per_lane * hw, 1))
        nb_want = max(1, lane_target // max(hw, 1))
        nb = min(nb_max, nb_want)
        if n > 1:
            nb = min(nb, max(1, n // 2))    # keep >=2 batch steps for megacore
        nb = _largest_divisor_leq(n, nb)

    grid = (pl.cdiv(n, nb), pl.cdiv(hw, s_tile))

    cost = pl.CostEstimate(
        flops=2 * n * hw * cin * cout,
        transcendentals=0,
        bytes_accessed=(n * cin * hw * x_item
                        + n * cout * hw * out_item
                        + w_mat.size * w_item
                        + b_mat.size * b_item),
    )

    out_mat = pl.pallas_call(
        _conv1x1_kernel,
        out_shape=jax.ShapeDtypeStruct((n, cout, hw), out_dtype),
        grid=grid,
        in_specs=[
            pl.BlockSpec((cout, cin), lambda b, s: (0, 0)),          # weight (resident)
            pl.BlockSpec((cout, 1), lambda b, s: (0, 0)),            # bias   (resident)
            pl.BlockSpec((nb, cin, s_tile), lambda b, s: (b, 0, s)),  # x block
        ],
        out_specs=pl.BlockSpec((nb, cout, s_tile), lambda b, s: (b, 0, s)),
        compiler_params=pltpu.CompilerParams(
            dimension_semantics=("parallel", "parallel"),
            vmem_limit_bytes=vmem_limit,
        ),
        cost_estimate=cost,
    )(w_mat, b_mat, x_mat)

    return out_mat.reshape(n, cout, h, w)


if __name__ == "__main__":
    key = jax.random.PRNGKey(0)
    k_x, k_w, k_b = jax.random.split(key, 3)

    # Small shapes consistent with Conv1(in_channels=4, out_channels=8)
    batch, in_channels, out_channels, H, W = 2, 4, 8, 16, 16

    x = jax.random.normal(k_x, (batch, in_channels, H, W), dtype=jnp.float32)

    # Deterministic synthetic parameters (PyTorch-style uniform bound 1/sqrt(fan_in))
    fan_in = in_channels * 1 * 1
    bound = 1.0 / (fan_in ** 0.5)
    weight = jax.random.uniform(
        k_w, (out_channels, in_channels, 1, 1), jnp.float32, -bound, bound)
    bias = jax.random.uniform(k_b, (out_channels,), jnp.float32, -bound, bound)

    out = conv1_forward(x, weight, bias)
    jax.block_until_ready(out)

    # Reference check in plain JAX
    ref = (
        jnp.einsum("nchw,oc->nohw", x, weight.reshape(out_channels, in_channels))
        + bias[None, :, None, None]
    )
    assert out.shape == (batch, out_channels, H, W)
    assert jnp.allclose(out, ref, atol=1e-5), "mismatch vs reference"

    print("KERNEL_OK")
</pallas_src>

<mosaic_0001>
module attributes {stable_mosaic.version = 11 : i64} {
  func.func @_conv1x1_kernel(%arg0: i32, %arg1: i32, %arg2: memref<8x4xf32, #tpu.memory_space<vmem>>, %arg3: memref<8x1xf32, #tpu.memory_space<vmem>>, %arg4: memref<1x4x256xf32, #tpu.memory_space<vmem>>, %arg5: memref<1x8x256xf32, #tpu.memory_space<vmem>>) attributes {dimension_semantics = [#tpu.dimension_semantics<parallel>, #tpu.dimension_semantics<parallel>], iteration_bounds = array<i64: 2, 1>, scalar_prefetch = 0 : i64, scratch_operands = 0 : i64, tpu.core_type = #tpu.core_type<tc>, window_params = [{pipeline_mode = #tpu.pipeline_mode<synchronous>, transform_indices = @transform_0, window_bounds = array<i64: 8, 4>}, {pipeline_mode = #tpu.pipeline_mode<synchronous>, transform_indices = @transform_1, window_bounds = array<i64: 8, 1>}, {transform_indices = @transform_2, window_bounds = array<i64: 1, 4, 256>}, {transform_indices = @transform_3, window_bounds = array<i64: 1, 8, 256>}]} {
    %c0 = arith.constant 0 : index
    %c0_0 = arith.constant 0 : index
    %0 = vector.load %arg2[%c0, %c0_0] : memref<8x4xf32, #tpu.memory_space<vmem>>, vector<8x4xf32>
    %c0_1 = arith.constant 0 : index
    %c0_2 = arith.constant 0 : index
    %c0_3 = arith.constant 0 : index
    %1 = vector.load %arg4[%c0_1, %c0_2, %c0_3] : memref<1x4x256xf32, #tpu.memory_space<vmem>>, vector<1x4x256xf32>
    "tpu.trace_start"() <{level = 10 : i32, message = "oc,bcs->bos"}> : () -> ()
    %cst = arith.constant dense<0.000000e+00> : vector<1x256x8xf32>
    %2 = tpu.matmul %1, %0, %cst {dimension_numbers = #tpu.dot_dimension_numbers<[1], [1], [0, 2], [0], [0, 0, 0, 2, 1, 0], [], []>} : vector<1x4x256xf32>, vector<8x4xf32>, vector<1x256x8xf32> -> vector<1x256x8xf32>
    %3 = tpu.transpose %2, [0, 2, 1] : vector<1x256x8xf32> -> vector<1x8x256xf32>
    "tpu.trace_stop"() : () -> ()
    %c0_4 = arith.constant 0 : index
    %c0_5 = arith.constant 0 : index
    %4 = vector.load %arg3[%c0_4, %c0_5] : memref<8x1xf32, #tpu.memory_space<vmem>>, vector<8x1xf32>
    %5 = vector.shape_cast %4 : vector<8x1xf32> to vector<1x8x1xf32>
    %6 = vector.broadcast %5 : vector<1x8x1xf32> to vector<1x8x256xf32>
    %7 = arith.addf %3, %6 : vector<1x8x256xf32>
    %c0_6 = arith.constant 0 : index
    %c0_7 = arith.constant 0 : index
    %c0_8 = arith.constant 0 : index
    %8 = vector.load %arg5[%c0_6, %c0_7, %c0_8] : memref<1x8x256xf32, #tpu.memory_space<vmem>>, vector<1x8x256xf32>
    tpu.vector_store %arg5[%c0_6, %c0_7, %c0_8], %7 {strides = array<i32>} : memref<1x8x256xf32, #tpu.memory_space<vmem>>, vector<1x8x256xf32>,
    return
  }
  func.func @transform_0(%arg0: i32, %arg1: i32) -> (i32, i32) {
    %c0_i32 = arith.constant 0 : i32
    %c0_i32_0 = arith.constant 0 : i32
    %c0_i32_1 = arith.constant 0 : i32
    return %c0_i32, %c0_i32_0 : i32, i32
  }
  func.func @transform_1(%arg0: i32, %arg1: i32) -> (i32, i32) {
    %c0_i32 = arith.constant 0 : i32
    %c0_i32_0 = arith.constant 0 : i32
    %c0_i32_1 = arith.constant 0 : i32
    return %c0_i32, %c0_i32_0 : i32, i32
  }
  func.func @transform_2(%arg0: i32, %arg1: i32) -> (i32, i32, i32) {
    %c0_i32 = arith.constant 0 : i32
    %c0_i32_0 = arith.constant 0 : i32
    return %arg0, %c0_i32, %arg1 : i32, i32, i32
  }
  func.func @transform_3(%arg0: i32, %arg1: i32) -> (i32, i32, i32) {
    %c0_i32 = arith.constant 0 : i32
    %c0_i32_0 = arith.constant 0 : i32
    return %arg0, %c0_i32, %arg1 : i32, i32, i32
  }
}

</mosaic_0001>

<bundles_post_ra>
// kernel: tpu_custom_call.1
= control target key start
LH: loop header
LB: loop body
LE: loop exit
PB: predicated region body
PF: predicated region fallthrough
CT: control target
= control target key end

     0   :  { %8 = vsyncpa [#allocation3], 0  ;;  %s1004_s0 = inlined_call_operand.vmem [shape: f32[8,4], index: 0, kind: input, shape index: {}]   ;;  %s1005_s1 = inlined_call_operand.vmem [shape: f32[8,1], index: 1, kind: input, shape index: {}]   ;;  %s1006_s2 = inlined_call_operand.vmem [shape: f32[2,4,256], index: 2, kind: input, shape index: {}]   ;;  %s1007_s3 = inlined_call_operand.hbm [shape: f32[2,8,256], index: 3, kind: output, shape index: {}]  }
   0x1   :  { %10 = vsyncpa [#allocation3 + $0x1], 0  ;;  %s865_s12 = smov 0   ;;  %s867_s13 = smov 0  }
   0x2   :  { %s869_s14 = smov 0   ;;  %s871_s15 = smov 0  }
   0x3   :  { %s873_s16 = smov 0   ;;  %s875_s17 = smov 0  }
   0x4 LB: > { %s654_s18 = sadd.s32 4294967295, %s842_s17   ;;  %s655_s19 = sadd.s32 4294967294, %s842_s17   ;;  %s842_s17 = sphi %s875_s17, %s16_s17   ;;  %s838_s16 = sphi %s873_s16, %s1014_s16   ;;  %s834_s15 = sphi %s871_s15, %s1013_s15   ;;  %s830_s14 = sphi %s869_s14, %s1012_s14   ;;  %s826_s13 = sphi %s867_s13, %s1011_s13   ;;  %s822_s12 = sphi %s865_s12, %s1010_s12  }
   0x5   : > { %s28_s20 = sadd.s32 1, %s838_s16  ;;  %s107_s21 = sadd.s32 1, %s830_s14 }
   0x6   : > { %p30_p0 = scmp.ge.s32.totalorder %s28_s20, 2  ;;  %p117_p1 = scmp.ne.s32.totalorder %s830_s14, %s826_s13 }
   0x7   : > { %p118_p2 = scmp.eq.s32.totalorder %s654_s18, 1  ;;  %p123_p3 = scmp.ne.s32.totalorder %s826_s13, %s822_s12 }
   0x8   : > { %s1016_s20 = smov (%p30_p0, %s28_s20), 0  ;;  %p124_p5 = scmp.eq.s32.totalorder %s655_s19, 1 }
   0x9   : > { %p905_p4 = por %p118_p2, %p117_p1  ;;  %s102_s23 = ssub.s32 %s838_s16, %s1016_s20 }
   0xa   : > { %p658_p6 = scmp.ge.s32.totalorder %s842_s17, 1  ;;  %p105_p7 = scmp.eq.s32.totalorder %s102_s23, 0 }
   0xb   : > { %p912_p8 = por %p124_p5, %p123_p3  ;;  %p161_p9 = scmp.lt.s32.totalorder %s842_s17, 3 }
   0xc   : > { %s918_s25 = scalar_select %p105_p7, %s830_s14, %s107_s21  }
   0xd   : > { %p162_p10 = pnand %p658_p6, %p161_p9 }
   0xe   : > { %p190_p11 = scmp.lt.s32.totalorder (!%p162_p10), %s834_s15, 1  ;;  %s186_s8 = sand.u32 (!%p162_p10), 1, %s826_s13  }
   0xf   : > { %165 = sbr.rel (%p162_p10) target bundleno = 783 (0x30f), region = 32  ;;  %s659_s9 = sshll.u32 (!%p162_p10), %s186_s8, 4 }
  0x10   : > { %s701_s10 = sshll.u32 (!%p162_p10), %s834_s15, 4  ;;  %s188_s21 = scalar_lea.vmem (!%p162_p10), [#allocation2], %s659_s9 }
  0x11   : > { %s573_s19 = scalar_lea.hbm (!%p162_p10), %s1007_s3, %s701_s10  ;;  %s575_s23 = sshll.u32 (!%p162_p10), %s188_s21, 4  ;;  %s576_s23 = int_to_ptr.vmem [resolvable:$true] %s575_s23 }
  0x12   : > { %s784_s4 = scalar_lea.hbm (!%p162_p10), %s1007_s3, 32 }
  0x14   : > { %s191_s26 = scalar_select %p190_p11, %s834_s15, 1  ;;  %v200_v2 = vld [vmem:[%s1004_s0] sm:$0xff]  ;;  %vm272_vm0 = vcmask 31744  }
  0x15   : > { %703 = vmatpush.xpose.msk.msra.mxu2 %vm272_vm0, %v200_v2  ;;  %704 = vmatpush.xpose.msk.msra.mxu3 %vm272_vm0, %v200_v2 }
  0x16   : > { %s700_s27 = sshll.u32 %s191_s26, 3  ;;  %662 = vmatpush.xpose.msk.msra.mxu0 %vm272_vm0, %v200_v2  ;;  %702 = vmatpush.xpose.msk.msra.mxu1 %vm272_vm0, %v200_v2  ;;  %s577_s26 = sshll.u32 %s573_s19, 4  ;;  %s578_s26 = int_to_ptr.hbm [resolvable:$true] %s577_s26 }
  0x17   : > { %s197_s30 = scalar_lea.vmem %s1006_s2, %s700_s27  ;;  %s560_s27 = scalar_lea.sflag [#allocation3], %s186_s8 }
  0x18   : > { %v201_v0 = vld [vmem:[%s197_s30] sm:$0xff]  ;;  %s778_s28 = sshra.s32 %s578_s26, 4  ;;  %s779_s28 = int_to_ptr.hbm [resolvable:$true] %s778_s28 }
  0x19   : > { %203 = vst [vmem:[#allocation1] ss:$2 sm:$0xff] %v201_v0  ;;  %v844_v0 = vmov 0   ;;  %s780_s15 = scalar_lea.hbm %s779_s28, 16  ;;  %p785_p1 = scmp.lt.s32.totalorder %s779_s28, %s1007_s3 }
  0x1a   : > { %p781_p12 = scmp.ne.s32.totalorder %s779_s28, %s780_s15  ;;  %p786_p2 = scmp.lt.s32.totalorder %s784_s4, %s780_s15 }
  0x1c   : > { %p782_p13 = pnand %p781_p12, %p905_p4  ;;  %p787_p3 = por %p786_p2, %p785_p1 }
  0x1e   : > { %p783_p0 = pneg %p782_p13 }
  0x20   : > { %v205_v1 = vld.sshfl [vmem:[#allocation1 + $0x8] sm:$0xff pattern:$0x75316420]  ;;  %v204_v3 = vld.sshfl [vmem:[#allocation1] sm:$0xff pattern:$0x75316420]  ;;  %p788_p5 = pnand %p787_p3, %p783_p0 }
  0x21   : > { %240 = vxpose.xlu0.b32.start.end [1/1] (short) %v205_v1, 128 }
  0xa1   : > { %208 = vxpose.xlu0.b32.start.end [1/1] (short) %v204_v3, 128 }
  0xc5   : > { %v256_v4 = vpop.trf.xlu0 }
  0xc6   : > { %679 = vmatmul.msk.f32.vlgmr.msra.gmra.mxu2 %vm272_vm0, %v256_v4 }
  0xcd   : > { %v257_v5 = vpop.trf.xlu0 }
  0xce   : > { %680 = vmatmul.msk.f32.gmra.mxu2 %vm272_vm0, %v257_v5  ;;  %v549_v5 = vld [vmem:[%s1005_s1] sm:$0xff] }
  0xd5   : > { %v258_v6 = vpop.trf.xlu0 }
  0xd6   : > { %681 = vmatmul.msk.f32.gmra.mxu2 %vm272_vm0, %v258_v6 }
  0xdd   : > { %v259_v7 = vpop.trf.xlu0 }
  0xde   : > { %682 = vmatmul.msk.f32.gmra.mxu2 %vm272_vm0, %v259_v7 }
  0xe5   : > { %v260_v8 = vpop.trf.xlu0 }
  0xe6   : > { %683 = vmatmul.msk.f32.gmra.mxu2 %vm272_vm0, %v260_v8 }
  0xed   : > { %v261_v9 = vpop.trf.xlu0 }
  0xee   : > { %684 = vmatmul.msk.f32.gmra.mxu2 %vm272_vm0, %v261_v9 }
  0xf5   : > { %v262_v10 = vpop.trf.xlu0 }
  0xf6   : > { %685 = vmatmul.msk.f32.gmra.mxu2 %vm272_vm0, %v262_v10 }
  0xfd   : > { %v263_v11 = vpop.trf.xlu0 }
  0xfe   : > { %686 = vmatmul.msk.f32.gmra.mxu2 %vm272_vm0, %v263_v11 }
 0x105   : > { %v264_v12 = vpop.trf.xlu0 }
 0x106   : > { %687 = vmatmul.msk.f32.vlgmr.msra.gmra.mxu3 %vm272_vm0, %v264_v12 }
 0x108   : > { %763 = vset.pattern.permute.xlu0 %v844_v0 }
 0x10d   : > { %v265_v13 = vpop.trf.xlu0 }
 0x10e   : > { %688 = vmatmul.msk.f32.gmra.mxu3 %vm272_vm0, %v265_v13 }
 0x115   : > { %v266_v14 = vpop.trf.xlu0 }
 0x116   : > { %689 = vmatmul.msk.f32.gmra.mxu3 %vm272_vm0, %v266_v14 }
 0x11d   : > { %v267_v15 = vpop.trf.xlu0 }
 0x11e   : > { %690 = vmatmul.msk.f32.gmra.mxu3 %vm272_vm0, %v267_v15 }
 0x125   : > { %v268_v16 = vpop.trf.xlu0 }
 0x126   : > { %691 = vmatmul.msk.f32.gmra.mxu3 %vm272_vm0, %v268_v16 }
 0x12d   : > { %v269_v17 = vpop.trf.xlu0 }
 0x12e   : > { %692 = vmatmul.msk.f32.gmra.mxu3 %vm272_vm0, %v269_v17 }
 0x135   : > { %v270_v18 = vpop.trf.xlu0 }
 0x136   : > { %693 = vmatmul.msk.f32.gmra.mxu3 %vm272_vm0, %v270_v18 }
 0x13d   : > { %v271_v19 = vpop.trf.xlu0 }
 0x13e   : > { %694 = vmatmul.msk.f32.gmra.mxu3 %vm272_vm0, %v271_v19 }
 0x145   : > { %v224_v20 = vpop.trf.xlu0 }
 0x146   : > { %663 = vmatmul.msk.f32.vlgmr.msra.gmra.mxu0 %vm272_vm0, %v224_v20 }
 0x149   : > { %v437_v21 = vpop.f32.mrf.mxu2 }
 0x14a   : > { %517 = vxpose.xlu2.b32.start [1/16] (narrow) %v437_v21, 8 }
 0x14d   : > { %v225_v22 = vpop.trf.xlu0 }
 0x14e   : > { %664 = vmatmul.msk.f32.gmra.mxu0 %vm272_vm0, %v225_v22 }
 0x151   : > { %v440_v23 = vpop.f32.mrf.mxu2 }
 0x152   : > { %518 = vxpose.xlu2.b32.cont [2/16] (narrow) %v440_v23, 8 }
 0x155   : > { %v226_v24 = vpop.trf.xlu0 }
 0x156   : > { %665 = vmatmul.msk.f32.gmra.mxu0 %vm272_vm0, %v226_v24 }
 0x159   : > { %v443_v25 = vpop.f32.mrf.mxu2 }
 0x15a   : > { %519 = vxpose.xlu2.b32.cont [3/16] (narrow) %v443_v25, 8 }
 0x15d   : > { %v227_v26 = vpop.trf.xlu0 }
 0x15e   : > { %666 = vmatmul.msk.f32.gmra.mxu0 %vm272_vm0, %v227_v26 }
 0x161   : > { %v446_v27 = vpop.f32.mrf.mxu2 }
 0x162   : > { %520 = vxpose.xlu2.b32.cont [4/16] (narrow) %v446_v27, 8 }
 0x165   : > { %v228_v28 = vpop.trf.xlu0 }
 0x166   : > { %667 = vmatmul.msk.f32.gmra.mxu0 %vm272_vm0, %v228_v28 }
 0x169   : > { %v449_v29 = vpop.f32.mrf.mxu2 }
 0x16a   : > { %521 = vxpose.xlu2.b32.cont [5/16] (narrow) %v449_v29, 8 }
 0x16d   : > { %v229_v30 = vpop.trf.xlu0 }
 0x16e   : > { %668 = vmatmul.msk.f32.gmra.mxu0 %vm272_vm0, %v229_v30 }
 0x171   : > { %v452_v31 = vpop.f32.mrf.mxu2 }
 0x172   : > { %522 = vxpose.xlu2.b32.cont [6/16] (narrow) %v452_v31, 8 }
 0x175   : > { %v230_v32 = vpop.trf.xlu0 }
 0x176   : > { %669 = vmatmul.msk.f32.gmra.mxu0 %vm272_vm0, %v230_v32 }
 0x179   : > { %v455_v33 = vpop.f32.mrf.mxu2 }
 0x17a   : > { %523 = vxpose.xlu2.b32.cont [7/16] (narrow) %v455_v33, 8 }
 0x17d   : > { %v231_v34 = vpop.trf.xlu0 }
 0x17e   : > { %670 = vmatmul.msk.f32.gmra.mxu0 %vm272_vm0, %v231_v34 }
 0x181   : > { %v458_v35 = vpop.f32.mrf.mxu2 }
 0x182   : > { %524 = vxpose.xlu2.b32.cont [8/16] (narrow) %v458_v35, 8 }
 0x185   : > { %v232_v36 = vpop.trf.xlu0 }
 0x186   : > { %671 = vmatmul.msk.f32.vlgmr.msra.gmra.mxu1 %vm272_vm0, %v232_v36 }
 0x189   : > { %v461_v37 = vpop.f32.mrf.mxu3 }
 0x18a   : > { %525 = vxpose.xlu2.b32.cont [9/16] (narrow) %v461_v37, 8 }
 0x18d   : > { %v233_v38 = vpop.trf.xlu0 }
 0x18e   : > { %672 = vmatmul.msk.f32.gmra.mxu1 %vm272_vm0, %v233_v38 }
 0x191   : > { %v464_v39 = vpop.f32.mrf.mxu3 }
 0x192   : > { %526 = vxpose.xlu2.b32.cont [10/16] (narrow) %v464_v39, 8 }
 0x195   : > { %v234_v40 = vpop.trf.xlu0 }
 0x196   : > { %673 = vmatmul.msk.f32.gmra.mxu1 %vm272_vm0, %v234_v40 }
 0x199   : > { %v467_v41 = vpop.f32.mrf.mxu3 }
 0x19a   : > { %527 = vxpose.xlu2.b32.cont [11/16] (narrow) %v467_v41, 8 }
 0x19d   : > { %v235_v42 = vpop.trf.xlu0 }
 0x19e   : > { %674 = vmatmul.msk.f32.gmra.mxu1 %vm272_vm0, %v235_v42 }
 0x1a1   : > { %v470_v43 = vpop.f32.mrf.mxu3 }
 0x1a2   : > { %528 = vxpose.xlu2.b32.cont [12/16] (narrow) %v470_v43, 8 }
 0x1a5   : > { %v236_v44 = vpop.trf.xlu0 }
 0x1a6   : > { %675 = vmatmul.msk.f32.gmra.mxu1 %vm272_vm0, %v236_v44 }
 0x1a9   : > { %v473_v45 = vpop.f32.mrf.mxu3 }
 0x1aa   : > { %529 = vxpose.xlu2.b32.cont [13/16] (narrow) %v473_v45, 8 }
 0x1ad   : > { %v237_v46 = vpop.trf.xlu0 }
 0x1ae   : > { %676 = vmatmul.msk.f32.gmra.mxu1 %vm272_vm0, %v237_v46 }
 0x1b1   : > { %v476_v47 = vpop.f32.mrf.mxu3 }
 0x1b2   : > { %530 = vxpose.xlu2.b32.cont [14/16] (narrow) %v476_v47, 8 }
 0x1b5   : > { %v238_v48 = vpop.trf.xlu0 }
 0x1b6   : > { %677 = vmatmul.msk.f32.gmra.mxu1 %vm272_vm0, %v238_v48 }
 0x1b9   : > { %v479_v49 = vpop.f32.mrf.mxu3 }
 0x1ba   : > { %531 = vxpose.xlu2.b32.cont [15/16] (narrow) %v479_v49, 8 }
 0x1bd   : > { %v239_v50 = vpop.trf.xlu0 }
 0x1be   : > { %678 = vmatmul.msk.f32.gmra.mxu1 %vm272_vm0, %v239_v50 }
 0x1c1   : > { %v482_v51 = vpop.f32.mrf.mxu3 }
 0x1c2   : > { %532 = vxpose.xlu2.b32.end [16/16] (narrow) %v482_v51, 8 }
 0x1c3   : > { %v389_v52 = vpop.f32.mrf.mxu0 }
 0x1c4   : > { %485 = vxpose.xlu1.b32.start [1/16] (narrow) %v389_v52, 8 }
 0x1cb   : > { %v392_v53 = vpop.f32.mrf.mxu0 }
 0x1cc   : > { %486 = vxpose.xlu1.b32.cont [2/16] (narrow) %v392_v53, 8 }
 0x1d3   : > { %v395_v54 = vpop.f32.mrf.mxu0 }
 0x1d4   : > { %487 = vxpose.xlu1.b32.cont [3/16] (narrow) %v395_v54, 8 }
 0x1db   : > { %v398_v55 = vpop.f32.mrf.mxu0 }
 0x1dc   : > { %488 = vxpose.xlu1.b32.cont [4/16] (narrow) %v398_v55, 8 }
 0x1e3   : > { %v401_v56 = vpop.f32.mrf.mxu0  ;;  %v533_v7 = vpop.trf.xlu2 }
 0x1e4   : > { %489 = vxpose.xlu1.b32.cont [5/16] (narrow) %v401_v56, 8 }
 0x1eb   : > { %v404_v57 = vpop.f32.mrf.mxu0 }
 0x1ec   : > { %490 = vxpose.xlu1.b32.cont [6/16] (narrow) %v404_v57, 8 }
 0x1f3   : > { %v407_v58 = vpop.f32.mrf.mxu0 }
 0x1f4   : > { %491 = vxpose.xlu1.b32.cont [7/16] (narrow) %v407_v58, 8 }
 0x1fb   : > { %v410_v59 = vpop.f32.mrf.mxu0 }
 0x1fc   : > { %492 = vxpose.xlu1.b32.cont [8/16] (narrow) %v410_v59, 8 }
 0x203   : > { %v413_v60 = vpop.f32.mrf.mxu1 }
 0x204   : > { %493 = vxpose.xlu1.b32.cont [9/16] (narrow) %v413_v60, 8 }
 0x20b   : > { %v416_v61 = vpop.f32.mrf.mxu1 }
 0x20c   : > { %494 = vxpose.xlu1.b32.cont [10/16] (narrow) %v416_v61, 8 }
 0x213   : > { %v419_v62 = vpop.f32.mrf.mxu1 }
 0x214   : > { %495 = vxpose.xlu1.b32.cont [11/16] (narrow) %v419_v62, 8 }
 0x21b   : > { %v422_v63 = vpop.f32.mrf.mxu1 }
 0x21c   : > { %496 = vxpose.xlu1.b32.cont [12/16] (narrow) %v422_v63, 8 }
 0x223   : > { %v425_v1 = vpop.f32.mrf.mxu1 }
 0x224   : > { %497 = vxpose.xlu1.b32.cont [13/16] (narrow) %v425_v1, 8 }
 0x22b   : > { %v428_v2 = vpop.f32.mrf.mxu1 }
 0x22c   : > { %498 = vxpose.xlu1.b32.cont [14/16] (narrow) %v428_v2, 8 }
 0x233   : > { %v431_v3 = vpop.f32.mrf.mxu1 }
 0x234   : > { %499 = vxpose.xlu1.b32.cont [15/16] (narrow) %v431_v3, 8 }
 0x23b   : > { %v434_v4 = vpop.f32.mrf.mxu1 }
 0x23c   : > { %500 = vxpose.xlu1.b32.end [16/16] (narrow) %v434_v4, 8 }
 0x268   : > { %v501_v6 = vpop.trf.xlu1 }
 0x28f   : > { %762 = vset.pattern.permute.xlu1 %v844_v0 }
 0x296   : > { %552 = vperm.xlu1 %762, %v549_v5  }
 0x308   : > { %v553_v8 = vpop.permute.xlu1 %552 }
 0x309   : > { %v555_v9 = vadd.f32 %v553_v8, %v501_v6  ;;  %v556_v10 = vadd.f32 %v553_v8, %v533_v7 }
 0x30b   : > { %557 = vst [vmem:[%s188_s21] sm:$0xff] %v555_v9 }
 0x30c   : > { %558 = vst [vmem:[%s188_s21 + $0x8] sm:$0xff] %v556_v10 }
 0x30d   : > { %791 = shalt.err (!%p788_p5)
}
 0x30e   : > { %705 = dma.vmem_to_hbm [thread:$0]  (%p905_p4), %s576_s23, 256, %s578_s26, %s560_s27  }
 0x30f PF: > { %p711_p6 = scmp.ge.s32.totalorder %s842_s17, 2  ;;  %s589_s7 = sand.u32 1, %s822_s12  }
 0x310   : > { %s590_s8 = scalar_lea.sflag [#allocation3], %s589_s7 }
 0x311   : > { %p708_p7 = pnand %p711_p6, %p912_p8 }
 0x313   : > { %p709_p9 = pneg %p708_p7 }
 0x315   : > { %817 = dma.done.wait (%p709_p9), %s590_s8, 256  }
 0x316   : > { %819 = vsyncadd (%p709_p9), %s590_s8, 4294967040  ;;  %s16_s17 = sadd.s32 1, %s842_s17   ;;  %s1010_s12 = smov %s826_s13 }
 0x317   : > { %p13_p10 = scmp.ge.s32.totalorder %s16_s17, 4   ;;  %s1011_s13 = smov %s830_s14 }
 0x318   : > { %s1012_s14 = smov %s918_s25  ;;  %s1013_s15 = smov %s838_s16 }
 0x319   : > { %s1014_s16 = smov %s1016_s20  ;;  %15 = sbr.rel (!%p13_p10) target bundleno = 4 (0x4), region = 67 }
 0x31e   :  { %596 = vsyncpa [#allocation3], 1 }
 0x31f   :  { %598 = vsyncpa [#allocation3 + $0x1], 1 }

</bundles_post_ra>
